<compile_context>
chip_gen: v7x
topology: tpu7x:2x2x1
jax: 0.10.0
libtpu: 0.0.40
codegen_flags: <defaults>
</compile_context>

<pallas_src>
import functools

import jax
import jax.numpy as jnp
from jax import lax
from jax.experimental import pallas as pl
from jax.experimental.pallas import tpu as pltpu

LN_EPS = 1e-5
_MIB = 1024 * 1024


def _self_output_kernel(x_ref, res_ref, w_ref, b_ref, g_ref, beta_ref, o_ref,
                        *, mxu_dtype):
    # Dense: x @ W on the MXU with f32 accumulation (bf16 operands by default).
    x = x_ref[...]
    if mxu_dtype is not None:
        x = x.astype(mxu_dtype)
    h = jnp.dot(x, w_ref[...], preferred_element_type=jnp.float32)
    h = h + b_ref[...]                       # (1, H) f32 bias broadcasts over rows

    # Dropout (inference) -> identity, then residual add in f32.
    h = h + res_ref[...].astype(jnp.float32)

    # LayerNorm over the hidden axis: biased variance, eps=1e-5 (BertLayerNorm).
    u = jnp.mean(h, axis=-1, keepdims=True)
    c = h - u
    s = jnp.mean(c * c, axis=-1, keepdims=True)
    xn = c * lax.rsqrt(s + LN_EPS)           # rsqrt -> EUP (free slot)

    o_ref[...] = (g_ref[...] * xn + beta_ref[...]).astype(o_ref.dtype)


def _round_up(x, m):
    return -(-x // m) * m


def _vmem_capacity_bytes():
    try:
        info = pltpu.get_tpu_info()
        cap = getattr(info, "vmem_capacity_bytes", None)
        if cap:
            return int(cap)
    except Exception:
        pass
    return 128 * _MIB


def _select_tiling(M, H, x_dtype, r_dtype, w_dtype, block_m):
    """Pick (bm, vmem_limit_bytes, deep_input_buffers) per TPU generation."""
    cap = _vmem_capacity_bytes()
    small_vmem = cap <= 96 * _MIB            # v7x: 64 MiB per TensorCore
    if block_m is None:
        block_m = 512 if small_vmem else 1024
    block_m = max(8, _round_up(int(block_m), 8))

    if M <= 8:
        bm = M                                # full-extent sublane dim
    elif M <= block_m:
        # >= 2 grid steps so the "parallel" axis feeds both v7x TensorCores.
        bm = _round_up(-(-M // 2), 8)
    else:
        bm = block_m

    deep_inputs = not small_vmem              # Buffered(3) inputs only with 128 MiB VMEM

    x_b = jnp.dtype(x_dtype).itemsize
    r_b = jnp.dtype(r_dtype).itemsize
    w_b = jnp.dtype(w_dtype).itemsize
    nbuf = 3 if deep_inputs else 2
    est = bm * H * (x_b * nbuf + r_b * nbuf + x_b * 2)    # streams (+2x out)
    est += H * H * w_b                                    # weight (single-buffered)
    est += 3 * H * 4                                      # bias / gamma / beta
    est += 3 * bm * H * 4                                 # f32 temps in LN epilogue
    ceiling = (cap * 3) // 4                              # 96 MiB (v5e/v6e), 48 MiB (v7x)
    vmem_limit = int(min(max(est + 8 * _MIB, 32 * _MIB), ceiling))
    return bm, vmem_limit, deep_inputs


@functools.partial(
    jax.jit,
    static_argnames=("bm", "mxu_dtype", "vmem_limit", "pipeline_hints", "deep_inputs"),
)
def _fused_self_output(hidden_states, input_tensor, w, b, gamma, beta, *,
                       bm, mxu_dtype, vmem_limit, pipeline_hints, deep_inputs):
    B, S, H = hidden_states.shape
    M = B * S

    x2d = hidden_states.reshape(M, H)         # streamed in native dtype (no extra pass)
    r2d = input_tensor.reshape(M, H)
    # Grid-invariant weight: cast once in the wrapper graph (negligible HBM,
    # halves its VMEM residency, guarantees bf16 MXU operands).
    w_mx = w if mxu_dtype is None else w.astype(mxu_dtype)
    b2d = b.reshape(1, H).astype(jnp.float32)
    g2d = gamma.reshape(1, H).astype(jnp.float32)
    beta2d = beta.reshape(1, H).astype(jnp.float32)

    def stream_spec():
        if pipeline_hints and deep_inputs:
            return pl.BlockSpec((bm, H), lambda i: (i, 0),
                                pipeline_mode=pl.Buffered(3))
        return pl.BlockSpec((bm, H), lambda i: (i, 0))

    def invariant_spec(shape):
        if pipeline_hints:
            return pl.BlockSpec(shape, lambda i: (0, 0),
                                pipeline_mode=pl.Buffered(1))
        return pl.BlockSpec(shape, lambda i: (0, 0))

    x_b_sz = x2d.dtype.itemsize
    r_b_sz = r2d.dtype.itemsize
    w_b_sz = w_mx.dtype.itemsize
    cost = pl.CostEstimate(
        flops=2 * M * H * H + 10 * M * H,
        transcendentals=M,                                     # one rsqrt per row
        bytes_accessed=M * H * (x_b_sz + r_b_sz + x_b_sz) + H * H * w_b_sz + 3 * H * 4,
    )

    out2d = pl.pallas_call(
        functools.partial(_self_output_kernel, mxu_dtype=mxu_dtype),
        out_shape=jax.ShapeDtypeStruct((M, H), x2d.dtype),
        grid_spec=pltpu.PrefetchScalarGridSpec(
            num_scalar_prefetch=0,
            grid=(pl.cdiv(M, bm),),            # ragged last block masked by Pallas
            in_specs=[
                stream_spec(),                 # x tile
                stream_spec(),                 # residual tile
                invariant_spec((H, H)),        # dense weight (DMA'd once)
                invariant_spec((1, H)),        # dense bias
                invariant_spec((1, H)),        # LN gamma
                invariant_spec((1, H)),        # LN beta
            ],
            out_specs=pl.BlockSpec((bm, H), lambda i: (i, 0)),
        ),
        compiler_params=pltpu.CompilerParams(
            dimension_semantics=("parallel",),   # shard M across TCs on v7x
            vmem_limit_bytes=vmem_limit,
        ),
        cost_estimate=cost,
    )(x2d, r2d, w_mx, b2d, g2d, beta2d)

    return out2d.reshape(B, S, H)


_PIPELINE_HINTS_OK = None   # does this JAX build accept BlockSpec pipeline_mode hints?


def bert_self_output(hidden_states, input_tensor, w, b, gamma, beta,
                     block_m=None, mxu_dtype=jnp.bfloat16):
    """Fused BertSelfOutput forward (inference).

    hidden_states, input_tensor: [B, S, H]
    w: [H, H] stored as (in, out); b / gamma / beta: [H]
    block_m: token rows per tile (None -> per-generation default).
    mxu_dtype: operand dtype for the MXU matmul (default bf16; None keeps the
      native dtype).  Accumulation and all LayerNorm math are float32.
    """
    global _PIPELINE_HINTS_OK
    B, S, H = hidden_states.shape
    M = B * S
    w_dtype = w.dtype if mxu_dtype is None else jnp.dtype(mxu_dtype)
    bm, vmem_limit, deep_inputs = _select_tiling(
        M, H, hidden_states.dtype, input_tensor.dtype, w_dtype, block_m)

    kwargs = dict(bm=bm, mxu_dtype=mxu_dtype, vmem_limit=vmem_limit,
                  deep_inputs=deep_inputs)
    if _PIPELINE_HINTS_OK is not False:
        try:
            out = _fused_self_output(hidden_states, input_tensor, w, b, gamma,
                                     beta, pipeline_hints=True, **kwargs)
            _PIPELINE_HINTS_OK = True
            return out
        except Exception:
            # Older/different Pallas builds without pipeline_mode hints.
            _PIPELINE_HINTS_OK = False
    return _fused_self_output(hidden_states, input_tensor, w, b, gamma, beta,
                              pipeline_hints=False, **kwargs)


def _reference(hidden_states, input_tensor, w, b, gamma, beta):
    h = jnp.einsum("bsh,ho->bso", hidden_states, w) + b
    h = h + input_tensor
    u = jnp.mean(h, axis=-1, keepdims=True)
    s = jnp.mean((h - u) ** 2, axis=-1, keepdims=True)
    xn = (h - u) / jnp.sqrt(s + LN_EPS)
    return gamma * xn + beta


if __name__ == "__main__":
    batch, seq, hidden = 2, 8, 32

    key = jax.random.PRNGKey(0)
    k1, k2, k3, k4 = jax.random.split(key, 4)

    hidden_states = jax.random.normal(k1, (batch, seq, hidden), dtype=jnp.float32)
    input_tensor = jax.random.normal(k2, (batch, seq, hidden), dtype=jnp.float32)

    # nn.Linear(hidden, hidden): synthetic init, stored as [in, out].
    w = jax.random.normal(k3, (hidden, hidden), dtype=jnp.float32) * 0.02
    b = jax.random.normal(k4, (hidden,), dtype=jnp.float32) * 0.02

    # BertLayerNorm init: weight=ones, bias=zeros.
    gamma = jnp.ones((hidden,), dtype=jnp.float32)
    beta = jnp.zeros((hidden,), dtype=jnp.float32)

    ref = _reference(hidden_states, input_tensor, w, b, gamma, beta)

    # Default path: f32 streams, bf16 MXU operands, f32 accumulate + f32 LN.
    out = bert_self_output(hidden_states, input_tensor, w, b, gamma, beta)
    out = jax.block_until_ready(out)
    assert out.shape == (batch, seq, hidden)
    assert out.dtype == hidden_states.dtype
    assert bool(jnp.allclose(out, ref, atol=2e-2, rtol=2e-2)), \
        "bf16-MXU path mismatch vs reference"

    # Native-dtype MXU path (no bf16 cast of x / w).
    out_f32 = bert_self_output(hidden_states, input_tensor, w, b, gamma, beta,
                               mxu_dtype=None)
    out_f32 = jax.block_until_ready(out_f32)
    assert bool(jnp.allclose(out_f32, ref, atol=2e-2, rtol=2e-2)), \
        "f32-MXU path mismatch vs reference"

    print("KERNEL_OK")
</pallas_src>

<mosaic_0001>
module attributes {stable_mosaic.version = 11 : i64} {
  func.func @_self_output_kernel(%arg0: i32, %arg1: memref<8x32xf32, #tpu.memory_space<vmem>>, %arg2: memref<8x32xf32, #tpu.memory_space<vmem>>, %arg3: memref<32x32xbf16, #tpu.memory_space<vmem>>, %arg4: memref<1x32xf32, #tpu.memory_space<vmem>>, %arg5: memref<1x32xf32, #tpu.memory_space<vmem>>, %arg6: memref<1x32xf32, #tpu.memory_space<vmem>>, %arg7: memref<8x32xf32, #tpu.memory_space<vmem>>) attributes {dimension_semantics = [#tpu.dimension_semantics<parallel>], iteration_bounds = array<i64: 2>, scalar_prefetch = 0 : i64, scratch_operands = 0 : i64, tpu.core_type = #tpu.core_type<tc>, window_params = [{transform_indices = @transform_0, window_bounds = array<i64: 8, 32>}, {transform_indices = @transform_1, window_bounds = array<i64: 8, 32>}, {pipeline_mode = #tpu.pipeline_mode<synchronous>, transform_indices = @transform_2, window_bounds = array<i64: 32, 32>}, {pipeline_mode = #tpu.pipeline_mode<synchronous>, transform_indices = @transform_3, window_bounds = array<i64: 1, 32>}, {pipeline_mode = #tpu.pipeline_mode<synchronous>, transform_indices = @transform_4, window_bounds = array<i64: 1, 32>}, {pipeline_mode = #tpu.pipeline_mode<synchronous>, transform_indices = @transform_5, window_bounds = array<i64: 1, 32>}, {transform_indices = @transform_6, window_bounds = array<i64: 8, 32>}]} {
    %c0 = arith.constant 0 : index
    %c0_0 = arith.constant 0 : index
    %0 = vector.load %arg1[%c0, %c0_0] : memref<8x32xf32, #tpu.memory_space<vmem>>, vector<8x32xf32>
    %1 = arith.truncf %0 : vector<8x32xf32> to vector<8x32xbf16>
    %c0_1 = arith.constant 0 : index
    %c0_2 = arith.constant 0 : index
    %2 = vector.load %arg3[%c0_1, %c0_2] : memref<32x32xbf16, #tpu.memory_space<vmem>>, vector<32x32xbf16>
    %cst = arith.constant dense<0.000000e+00> : vector<8x32xf32>
    %3 = tpu.matmul %1, %2, %cst {dimension_numbers = #tpu.dot_dimension_numbers<[1], [0], [0], [1], [0, 0, 1, 1], [], []>} : vector<8x32xbf16>, vector<32x32xbf16>, vector<8x32xf32> -> vector<8x32xf32>
    %c0_3 = arith.constant 0 : index
    %c0_4 = arith.constant 0 : index
    %4 = vector.load %arg4[%c0_3, %c0_4] : memref<1x32xf32, #tpu.memory_space<vmem>>, vector<1x32xf32>
    %5 = vector.broadcast %4 : vector<1x32xf32> to vector<8x32xf32>
    %6 = arith.addf %3, %5 : vector<8x32xf32>
    %c0_5 = arith.constant 0 : index
    %c0_6 = arith.constant 0 : index
    %7 = vector.load %arg2[%c0_5, %c0_6] : memref<8x32xf32, #tpu.memory_space<vmem>>, vector<8x32xf32>
    %8 = arith.addf %6, %7 : vector<8x32xf32>
    %cst_7 = arith.constant dense<0.000000e+00> : vector<8xf32>
    %9 = vector.multi_reduction <add>, %8, %cst_7 [1] : vector<8x32xf32> to vector<8xf32>
    %10 = vector.shape_cast %9 : vector<8xf32> to vector<8x1xf32>
    %cst_8 = arith.constant 3.200000e+01 : f32
    %11 = vector.broadcast %cst_8 : f32 to vector<8x1xf32>
    %12 = arith.divf %10, %11 : vector<8x1xf32>
    %13 = vector.broadcast %12 : vector<8x1xf32> to vector<8x32xf32>
    %14 = arith.subf %8, %13 : vector<8x32xf32>
    %15 = arith.mulf %14, %14 : vector<8x32xf32>
    %cst_9 = arith.constant dense<0.000000e+00> : vector<8xf32>
    %16 = vector.multi_reduction <add>, %15, %cst_9 [1] : vector<8x32xf32> to vector<8xf32>
    %17 = vector.shape_cast %16 : vector<8xf32> to vector<8x1xf32>
    %cst_10 = arith.constant 3.200000e+01 : f32
    %18 = vector.broadcast %cst_10 : f32 to vector<8x1xf32>
    %19 = arith.divf %17, %18 : vector<8x1xf32>
    %cst_11 = arith.constant 9.99999974E-6 : f32
    %20 = vector.broadcast %cst_11 : f32 to vector<8x1xf32>
    %21 = arith.addf %19, %20 : vector<8x1xf32>
    %22 = math.rsqrt %21 : vector<8x1xf32>
    %23 = vector.broadcast %22 : vector<8x1xf32> to vector<8x32xf32>
    %24 = arith.mulf %14, %23 : vector<8x32xf32>
    %c0_12 = arith.constant 0 : index
    %c0_13 = arith.constant 0 : index
    %25 = vector.load %arg5[%c0_12, %c0_13] : memref<1x32xf32, #tpu.memory_space<vmem>>, vector<1x32xf32>
    %26 = vector.broadcast %25 : vector<1x32xf32> to vector<8x32xf32>
    %27 = arith.mulf %26, %24 : vector<8x32xf32>
    %c0_14 = arith.constant 0 : index
    %c0_15 = arith.constant 0 : index
    %28 = vector.load %arg6[%c0_14, %c0_15] : memref<1x32xf32, #tpu.memory_space<vmem>>, vector<1x32xf32>
    %29 = vector.broadcast %28 : vector<1x32xf32> to vector<8x32xf32>
    %30 = arith.addf %27, %29 : vector<8x32xf32>
    %c0_16 = arith.constant 0 : index
    %c0_17 = arith.constant 0 : index
    %31 = vector.load %arg7[%c0_16, %c0_17] : memref<8x32xf32, #tpu.memory_space<vmem>>, vector<8x32xf32>
    tpu.vector_store %arg7[%c0_16, %c0_17], %30 {strides = array<i32>} : memref<8x32xf32, #tpu.memory_space<vmem>>, vector<8x32xf32>,
    return
  }
  func.func @transform_0(%arg0: i32) -> (i32, i32) {
    %c0_i32 = arith.constant 0 : i32
    %c0_i32_0 = arith.constant 0 : i32
    return %arg0, %c0_i32 : i32, i32
  }
  func.func @transform_1(%arg0: i32) -> (i32, i32) {
    %c0_i32 = arith.constant 0 : i32
    %c0_i32_0 = arith.constant 0 : i32
    return %arg0, %c0_i32 : i32, i32
  }
  func.func @transform_2(%arg0: i32) -> (i32, i32) {
    %c0_i32 = arith.constant 0 : i32
    %c0_i32_0 = arith.constant 0 : i32
    %c0_i32_1 = arith.constant 0 : i32
    return %c0_i32, %c0_i32_0 : i32, i32
  }
  func.func @transform_3(%arg0: i32) -> (i32, i32) {
    %c0_i32 = arith.constant 0 : i32
    %c0_i32_0 = arith.constant 0 : i32
    %c0_i32_1 = arith.constant 0 : i32
    return %c0_i32, %c0_i32_0 : i32, i32
  }
  func.func @transform_4(%arg0: i32) -> (i32, i32) {
    %c0_i32 = arith.constant 0 : i32
    %c0_i32_0 = arith.constant 0 : i32
    %c0_i32_1 = arith.constant 0 : i32
    return %c0_i32, %c0_i32_0 : i32, i32
  }
  func.func @transform_5(%arg0: i32) -> (i32, i32) {
    %c0_i32 = arith.constant 0 : i32
    %c0_i32_0 = arith.constant 0 : i32
    %c0_i32_1 = arith.constant 0 : i32
    return %c0_i32, %c0_i32_0 : i32, i32
  }
  func.func @transform_6(%arg0: i32) -> (i32, i32) {
    %c0_i32 = arith.constant 0 : i32
    %c0_i32_0 = arith.constant 0 : i32
    return %arg0, %c0_i32 : i32, i32
  }
}

</mosaic_0001>

<bundles_post_ra>
// kernel: _fused_self_output.1
= control target key start
LH: loop header
LB: loop body
LE: loop exit
PB: predicated region body
PF: predicated region fallthrough
CT: control target
= control target key end

     0   :  { %11 = vsyncpa [#allocation3], 0  ;;  %s749_s0 = inlined_call_operand.vmem [shape: f32[16,32], index: 0, kind: input, shape index: {}]   ;;  %s750_s1 = inlined_call_operand.vmem [shape: f32[16,32], index: 1, kind: input, shape index: {}]   ;;  %s751_s2 = inlined_call_operand.vmem [shape: bf16[32,32], index: 2, kind: input, shape index: {}]   ;;  %s752_s3 = inlined_call_operand.vmem [shape: f32[1,32], index: 3, kind: input, shape index: {}]   ;;  %s753_s4 = inlined_call_operand.vmem [shape: f32[1,32], index: 4, kind: input, shape index: {}]   ;;  %s754_s5 = inlined_call_operand.vmem [shape: f32[1,32], index: 5, kind: input, shape index: {}]   ;;  %s755_s6 = inlined_call_operand.hbm [shape: f32[16,32], index: 6, kind: output, shape index: {}]  }
   0x1   :  { %13 = vsyncpa [#allocation3 + $0x1], 0  ;;  %s627_s21 = smov 0   ;;  %s629_s22 = smov 0  }
   0x2   :  { %s631_s23 = smov 0   ;;  %s633_s24 = smov 0  }
   0x3 LB: > { %s648_s25 = sadd.s32 4294967295, %s587_s24   ;;  %s452_s26 = sadd.s32 4294967294, %s587_s24   ;;  %s587_s24 = sphi %s633_s24, %s761_s24   ;;  %s583_s23 = sphi %s631_s23, %s760_s23   ;;  %s579_s22 = sphi %s629_s22, %s759_s22   ;;  %s575_s21 = sphi %s627_s21, %s758_s21  }
   0x4   : > { %s652_s27 = sadd.s32 1, %s587_s24   ;;  %s162_s28 = sadd.s32 1, %s583_s23 }
   0x5   : > { %s159_s29 = ssub.s32 %s587_s24, %s652_s27  ;;  %p172_p0 = scmp.ne.s32.totalorder %s583_s23, %s579_s22 }
   0x6   : > { %p160_p1 = scmp.eq.s32.totalorder %s159_s29, 0  ;;  %p173_p2 = scmp.eq.s32.totalorder %s648_s25, 1 }
   0x7   : > { %p178_p3 = scmp.ne.s32.totalorder %s579_s22, %s575_s21  ;;  %p179_p4 = scmp.eq.s32.totalorder %s452_s26, 1 }
   0x8   : > { %s663_s30 = scalar_select %p160_p1, %s583_s23, %s162_s28  }
   0x9   : > { %p665_p5 = por %p173_p2, %p172_p0  ;;  %p669_p6 = por %p179_p4, %p178_p3 }
   0xa   : > { %p455_p7 = scmp.ge.s32.totalorder %s587_s24, 1  ;;  %p223_p8 = scmp.lt.s32.totalorder %s587_s24, 3 }
   0xc   : > { %p224_p9 = pnand %p455_p7, %p223_p8 }
   0xd   : > { %v521_v0 = vld [vmem:[%s751_s2] sm:$0xff] (!%p224_p9)   ;;  %v589_v1 = vmov (!%p224_p9), 0.0   ;;  %v522_v2 = vld [vmem:[%s751_s2 + $0x8] sm:$0xff] (!%p224_p9)   ;;  %vm590_vm0 = vmmov (!%p224_p9), 0   ;;  %p256_p10 = scmp.lt.s32.totalorder (!%p224_p9), %s648_s25, 1  ;;  %vm290_vm1 = vcmask (!%p224_p9), 261120  }
   0xe   : > { %227 = sbr.rel (%p224_p9) target bundleno = 571 (0x23b), region = 44  ;;  %472 = vmatprep.subr.bf16.mxu0 (!%p224_p9), %v589_v1  ;;  %476 = vmatprep.mubr.msk.bf16.mxu0 (!%p224_p9), %vm590_vm0, %v589_v1  ;;  %v459_v5 = vld [vmem:[%s752_s3] ss:$0 sm:$0xff] (!%p224_p9)  ;;  %s253_s29 = sand.u32 (!%p224_p9), 1, %s579_s22  }
   0xf   : > { %473 = vmatpush3.bf16.msra.mxu0 (!%p224_p9), %v521_v0  ;;  %s456_s9 = sshll.u32 (!%p224_p9), %s253_s29, 3  ;;  %v463_v23 = vld [vmem:[%s753_s4] ss:$0 sm:$0xff] (!%p224_p9) }
  0x10   : > { %474 = vmatprep.subr.bf16.mxu0 (!%p224_p9), %v589_v1  ;;  %v464_v25 = vld [vmem:[%s754_s5] ss:$0 sm:$0xff] (!%p224_p9)  ;;  %s255_s15 = scalar_lea.vmem (!%p224_p9), [#allocation2], %s456_s9 }
  0x11   : > { %s381_s16 = sshll.u32 (!%p224_p9), %s255_s15, 4  ;;  %s708_s16 = int_to_ptr.vmem [resolvable:$true] %s381_s16 }
  0x12   : > { %s525_s26 = scalar_lea.vmem (!%p224_p9), %s708_s16, 128 }
  0x13   : > { %475 = vmatpush3.bf16.msra.mxu0 (!%p224_p9), %v522_v2  ;;  %p526_p11 = scmp.ne.s32.totalorder (!%p224_p9), %s708_s16, %s525_s26 }
  0x15   : > { %s257_s13 = scalar_select %p256_p10, %s648_s25, 1 }
  0x16   : > { %p527_p12 = pnand %p526_p11, %p665_p5 }
  0x17   : > { %s457_s14 = sshll.u32 %s257_s13, 3 }
  0x18   : > { %s259_s17 = scalar_lea.vmem %s749_s0, %s457_s14  ;;  %s263_s20 = scalar_lea.vmem %s750_s1, %s457_s14 }
  0x19   : > { %v265_v3 = vld [vmem:[%s259_s17] sm:$0xff]  ;;  %s466_s14 = sshll.u32 %s648_s25, 7  ;;  %p528_p13 = pneg %p527_p12 }
  0x1a   : > { %v266_v4 = vpack.c.bf16 %v265_v3, %v265_v3  ;;  %v334_v7 = vld [vmem:[%s263_s20] sm:$0xff]  ;;  %s706_s19 = scalar_lea.hbm %s755_s6, %s466_s14  ;;  %s368_s20 = scalar_lea.sflag [#allocation3], %s253_s29 }
  0x1b   : > { %s591_s25 = smov [#allocation2]  }
  0x1c   : > { %477 = vmatmul.mubr.msk.bf16.vlgmr.msra.gmra.mrb[0].mxu0 %vm290_vm1, %v266_v4  ;;  %s529_s28 = sshll.u32 %s591_s25, 4  ;;  %s530_s28 = int_to_ptr.vmem [resolvable:$false] %s529_s28 }
  0x1d   : > { %s531_s9 = scalar_lea.vmem %s530_s28, 256  ;;  %p532_p0 = scmp.lt.s32.totalorder %s708_s16, %s530_s28 }
  0x1e   : > { %p533_p1 = scmp.lt.s32.totalorder %s531_s9, %s525_s26 }
  0x20   : > { %p534_p2 = por %p533_p1, %p532_p0 }
  0x22   : > { %p535_p3 = pnand %p534_p2, %p528_p13 }
  0xef   : > { %v328_v6 = vpop.f32.mrb[0].mxu0 }
  0xf0   : > { %v329_v8 = vadd.f32 %v459_v5, %v328_v6  ;;  %v478_v9 = vpop.f32.mrb[1].mxu0 }
  0xf1   : > { %v331_v10 = vpop.f32.mrb[2].mxu0 }
  0xf2   : > { %v479_v11 = vpop.f32.mrb[3].mxu0  ;;  %v335_v12 = vadd.f32 %v334_v7, %v329_v8 }
  0xf4   : > { %v336_v13 = vsel %vm290_vm1, %v335_v12, 0.0 }
  0xf5   : > { %337 = vadd.xlane.f32.xlu0 %v336_v13 }
 0x182   : > { %v338_v14 = vpop.xlane.xlu0 %337 }
 0x183   : > { %v340_v15 = vmul.f32 0.03125, %v338_v14 }
 0x185   : > { %v341_v16 = vsub.f32 %v335_v12, %v340_v15 }
 0x187   : > { %v342_v17 = vmul.f32 %v341_v16, %v341_v16 }
 0x189   : > { %v343_v18 = vsel %vm290_vm1, %v342_v17, 0.0 }
 0x18a   : > { %344 = vadd.xlane.f32.xlu0 %v343_v18 }
 0x217   : > { %v345_v19 = vpop.xlane.xlu0 %344 }
 0x218   : > { %v346_v20 = vmul.f32 0.03125, %v345_v19 }
 0x21a   : > { %v347_v21 = vadd.f32 1e-05, %v346_v20 }
 0x21c   : > { %523 = vrsqrt.f32 %v347_v21 }
 0x226   : > { %v524_v22 = vpop.eup %523 }
 0x227   : > { %v349_v24 = vmul.f32 %v524_v22, %v341_v16 }
 0x229   : > { %v357_v26 = vmul.f32 %v463_v23, %v349_v24 }
 0x22b   : > { %v365_v27 = vadd.f32 %v464_v25, %v357_v26 }
 0x22d   : > { %366 = vst.msk [vmem:[%s255_s15] sm:$0xff] %vm290_vm1, %v365_v27 }
 0x22e   : > { %538 = shalt.err (!%p535_p3)
}
 0x22f   : > { %s539_s29 = scalar_lea.hbm %s706_s19, 128  ;;  %s543_s12 = scalar_lea.hbm %s755_s6, 256 }
 0x230   : > { %p540_p4 = scmp.ne.s32.totalorder %s706_s19, %s539_s29  ;;  %p544_p9 = scmp.lt.u32.totalorder %s706_s19, %s755_s6 }
 0x231   : > { %p545_p10 = scmp.lt.u32.totalorder %s543_s12, %s539_s29  ;;  %p547_p12 = scmp.lt.u32.totalorder %s539_s29, %s706_s19 }
 0x232   : > { %p541_p7 = pnand %p540_p4, %p665_p5 }
 0x233   : > { %p546_p11 = por %p545_p10, %p544_p9 }
 0x234   : > { %p542_p8 = pneg %p541_p7 }
 0x235   : > { %p548_p13 = por %p547_p12, %p546_p11 }
 0x237   : > { %p549_p0 = pnand %p548_p13, %p542_p8 }
 0x239   : > { %552 = shalt.err (!%p549_p0)
}
 0x23a   : > { %480 = dma.vmem_to_hbm [thread:$0]  (%p665_p5), %s708_s16, 128, %s706_s19, %s368_s20  }
 0x23b PF: > { %p486_p1 = scmp.ge.s32.totalorder %s587_s24, 2  ;;  %s393_s15 = sand.u32 1, %s575_s21  }
 0x23c   : > { %s394_s17 = scalar_lea.sflag [#allocation3], %s393_s15 }
 0x23d   : > { %p483_p2 = pnand %p486_p1, %p669_p6 }
 0x23f   : > { %570 = dma.done.wait (!%p483_p2), %s394_s17, 128  }
 0x240   : > { %572 = vsyncadd (!%p483_p2), %s394_s17, 4294967168  ;;  %p16_p3 = scmp.ge.s32.totalorder %s652_s27, 4   ;;  %s758_s21 = smov %s579_s22 }
 0x241   : > { %s759_s22 = smov %s583_s23  ;;  %s760_s23 = smov %s663_s30 }
 0x242   : > { %s761_s24 = smov %s652_s27  ;;  %18 = sbr.rel (!%p16_p3) target bundleno = 3 (0x3), region = 82 }
 0x249   :  { %399 = vsyncpa [#allocation3], 1 }
 0x24a   :  { %401 = vsyncpa [#allocation3 + $0x1], 1 }

</bundles_post_ra>
